<compile_context>
chip_gen: v7x
topology: tpu7x:2x2x1
jax: 0.10.0
libtpu: 0.0.40
codegen_flags: <defaults>
</compile_context>

<pallas_src>
import functools

import jax
import jax.numpy as jnp
from jax.experimental import pallas as pl
from jax.experimental.pallas import tpu as pltpu


# ----------------------------------------------------------------------------
# Fused kernel: in-kernel x-projection + LSTM recurrence over one time block +
# (on the last grid step) LayerNorm + MLP head + Sigmoid.
# ----------------------------------------------------------------------------
def lstm_head_kernel(x_ref, wih_ref, bias_ref, whh_ref, w1_ref, slab_ref,
                     out_ref, h_scr, c_scr, gx_scr, *, t_blk, hidden, h_mid):
    n = pl.program_id(0)
    H = hidden
    H2 = h_mid
    T_b, B, F = x_ref.shape

    @pl.when(n == 0)
    def _():
        h_scr[...] = jnp.zeros_like(h_scr)
        c_scr[...] = jnp.zeros_like(c_scr)

    # ---- In-kernel input projection: one lane-dense bf16 MXU matmul per block.
    xb = x_ref[...].reshape(T_b * B, F).astype(jnp.bfloat16)        # (T*B, F)
    gx = jnp.dot(xb, wih_ref[...],
                 preferred_element_type=jnp.float32) + bias_ref[...]  # (T*B,4H)
    gx_scr[...] = gx.reshape(T_b, B, 4 * H)

    whh = whh_ref[...]                                              # (H,4H) bf16

    # ---- Recurrence: ONE fused (B,H)@(H,4H) matmul per step, dense EUP passes,
    #      gate extraction via static 32-lane slices (XLU slot).
    def step(t, carry):
        h, c = carry
        pre = gx_scr[t] + jnp.dot(h.astype(jnp.bfloat16), whh,
                                  preferred_element_type=jnp.float32)  # (B,4H)
        s = jax.nn.sigmoid(pre)          # one dense sigmoid pass
        th = jnp.tanh(pre)               # one dense tanh pass
        i_g = s[:, 0 * H:1 * H]
        f_g = s[:, 1 * H:2 * H]
        g_g = th[:, 2 * H:3 * H]
        o_g = s[:, 3 * H:4 * H]
        c = f_g * c + i_g * g_g
        h = o_g * jnp.tanh(c)
        return h, c

    h, c = jax.lax.fori_loop(0, t_blk, step, (h_scr[...], c_scr[...]),
                             unroll=True)
    h_scr[...] = h
    c_scr[...] = c

    @pl.when(n == pl.num_programs(0) - 1)
    def _():
        # LayerNorm(last hidden) -> Linear -> ReLU -> (Dropout=identity, eval)
        # -> Linear -> Sigmoid, fused here.  Small params come from one slab.
        slab = slab_ref[...]                                   # (1, P)
        gamma = slab[:, 0:H]
        beta = slab[:, H:2 * H]
        b1 = slab[:, 2 * H:2 * H + H2]
        w2v = slab[:, 2 * H + H2:2 * H + 2 * H2]               # (1, H2)
        b2 = slab[:, 2 * H + 2 * H2:2 * H + 2 * H2 + 1]        # (1, 1)

        mean = jnp.mean(h, axis=-1, keepdims=True)
        var = jnp.mean((h - mean) ** 2, axis=-1, keepdims=True)
        ln = (h - mean) * jax.lax.rsqrt(var + 1e-5)
        ln = ln * gamma + beta                                 # (B, H)

        y1 = jnp.dot(ln, w1_ref[...],
                     preferred_element_type=jnp.float32) + b1  # (B, H2)
        y1 = jnp.maximum(y1, 0.0)                              # ReLU
        # VPU multiply + lane reduction instead of an N=1 MXU matvec.
        y2 = jnp.sum(y1 * w2v, axis=-1, keepdims=True) + b2    # (B, 1)
        out_ref[...] = jax.nn.sigmoid(y2)


# ----------------------------------------------------------------------------
# Wrapper
# ----------------------------------------------------------------------------
def _pick_t_blk(T, B, F, H, budget_bytes):
    """Largest time block (dividing T) whose per-step VMEM footprint
    (double-buffered x block + gx scratch, f32) fits the budget."""
    per_t = 2 * B * F * 4 + B * 4 * H * 4
    t_blk = max(1, min(T, budget_bytes // per_t))
    while T % t_blk:
        t_blk -= 1
    return t_blk


def hybrid_headed_forward(x_btf, params, *, t_blk=None,
                          vmem_budget_bytes=8 * 1024 * 1024):
    """x_btf: (B, T, F) float32, like PyTorch batch_first input."""
    B, T, F = x_btf.shape
    H = params["w_hh_t"].shape[0]
    H2 = params["w1"].shape[1]

    if t_blk is None:
        t_blk = _pick_t_blk(T, B, F, H, vmem_budget_bytes)
    assert T % t_blk == 0, "T must be divisible by the time block"
    n_blocks = T // t_blk

    w_ih_b = params["w_ih_t"].astype(jnp.bfloat16)              # (F, 4H)
    w_hh_b = params["w_hh_t"].astype(jnp.bfloat16)              # (H, 4H)
    bias = (params["b_ih"] + params["b_hh"]).astype(jnp.float32).reshape(1, 4 * H)

    # Time-major x so each grid step DMAs one dense (t_blk, B, F) block.
    x_tbf = jnp.transpose(x_btf, (1, 0, 2)).astype(jnp.float32)  # (T, B, F)

    # Pack small head params into one lane-dense slab:
    #   [gamma(H), beta(H), b1(H2), w2(H2), b2(1), pad].
    slab_len = 2 * H + 2 * H2 + 1
    P = ((slab_len + 127) // 128) * 128
    slab = jnp.zeros((1, P), jnp.float32)
    slab = slab.at[0, 0:H].set(params["gamma"])
    slab = slab.at[0, H:2 * H].set(params["beta"])
    slab = slab.at[0, 2 * H:2 * H + H2].set(params["b1"])
    slab = slab.at[0, 2 * H + H2:2 * H + 2 * H2].set(params["w2"][:, 0])
    slab = slab.at[0, 2 * H + 2 * H2].set(params["b2"][0])

    out = pl.pallas_call(
        functools.partial(lstm_head_kernel, t_blk=t_blk, hidden=H, h_mid=H2),
        out_shape=jax.ShapeDtypeStruct((B, 1), jnp.float32),
        grid_spec=pltpu.PrefetchScalarGridSpec(
            num_scalar_prefetch=0,
            grid=(n_blocks,),
            in_specs=[
                pl.BlockSpec((t_blk, B, F), lambda n: (n, 0, 0)),   # x block
                pl.BlockSpec((F, 4 * H), lambda n: (0, 0)),         # W_ih bf16
                pl.BlockSpec((1, 4 * H), lambda n: (0, 0)),         # bias
                pl.BlockSpec((H, 4 * H), lambda n: (0, 0)),         # W_hh bf16
                pl.BlockSpec((H, H2), lambda n: (0, 0)),            # W1
                pl.BlockSpec((1, P), lambda n: (0, 0)),             # head slab
            ],
            out_specs=pl.BlockSpec((B, 1), lambda n: (0, 0)),
            scratch_shapes=[
                pltpu.VMEM((B, H), jnp.float32),            # h carry
                pltpu.VMEM((B, H), jnp.float32),            # c carry
                pltpu.VMEM((t_blk, B, 4 * H), jnp.float32),  # projected gates
            ],
        ),
        compiler_params=pltpu.CompilerParams(
            dimension_semantics=("arbitrary",),   # sequential recurrence
            vmem_limit_bytes=32 * 1024 * 1024,    # safe on v7x (64 MiB physical)
        ),
    )(x_tbf, w_ih_b, bias, w_hh_b, params["w1"], slab)
    return out


def init_params(key, input_features, hidden_size):
    F, H = input_features, hidden_size
    H2 = H // 2
    ks = jax.random.split(key, 8)
    s_lstm = 1.0 / jnp.sqrt(H)
    u = lambda k, shape, s: jax.random.uniform(k, shape, jnp.float32, -s, s)
    return {
        # LSTM, pre-transposed: W_ih (4H,F) -> (F,4H); W_hh (4H,H) -> (H,4H).
        # PyTorch gate order (i, f, g, o).
        "w_ih_t": u(ks[0], (F, 4 * H), s_lstm),
        "w_hh_t": u(ks[1], (H, 4 * H), s_lstm),
        "b_ih": u(ks[2], (4 * H,), s_lstm),
        "b_hh": u(ks[3], (4 * H,), s_lstm),
        # LayerNorm
        "gamma": jnp.ones((H,), jnp.float32),
        "beta": jnp.zeros((H,), jnp.float32),
        # Head: Linear(H, H//2), Linear(H//2, 1)
        "w1": u(ks[4], (H, H2), 1.0 / jnp.sqrt(H)),
        "b1": u(ks[5], (H2,), 1.0 / jnp.sqrt(H)),
        "w2": u(ks[6], (H2, 1), 1.0 / jnp.sqrt(H2)),
        "b2": u(ks[7], (1,), 1.0 / jnp.sqrt(H2)),
    }


# Pure-JAX reference (mirrors the bf16 matmul operands / f32 accumulation).
def reference_forward(x_btf, params):
    B, T, F = x_btf.shape
    H = params["w_hh_t"].shape[0]
    w_ih_b = params["w_ih_t"].astype(jnp.bfloat16)
    w_hh_b = params["w_hh_t"].astype(jnp.bfloat16)
    b = (params["b_ih"] + params["b_hh"])[None, :]
    h = jnp.zeros((B, H), jnp.float32)
    c = jnp.zeros((B, H), jnp.float32)
    for t in range(T):
        g = (jnp.dot(x_btf[:, t, :].astype(jnp.bfloat16), w_ih_b,
                     preferred_element_type=jnp.float32)
             + jnp.dot(h.astype(jnp.bfloat16), w_hh_b,
                       preferred_element_type=jnp.float32)
             + b)
        i = jax.nn.sigmoid(g[:, 0 * H:1 * H])
        f = jax.nn.sigmoid(g[:, 1 * H:2 * H])
        gg = jnp.tanh(g[:, 2 * H:3 * H])
        o = jax.nn.sigmoid(g[:, 3 * H:4 * H])
        c = f * c + i * gg
        h = o * jnp.tanh(c)
    mean = jnp.mean(h, -1, keepdims=True)
    var = jnp.mean((h - mean) ** 2, -1, keepdims=True)
    ln = (h - mean) / jnp.sqrt(var + 1e-5) * params["gamma"] + params["beta"]
    y1 = jnp.maximum(ln @ params["w1"] + params["b1"], 0.0)
    return jax.nn.sigmoid(y1 @ params["w2"] + params["b2"])


if __name__ == "__main__":
    # B=8 fills the 8 sublanes of a vreg; H=32 -> fused gate width 4H=128 lanes.
    B, T, F, H = 8, 8, 8, 32
    key = jax.random.PRNGKey(0)
    k_x, k_p = jax.random.split(key)
    x = jax.random.normal(k_x, (B, T, F), jnp.float32)
    params = init_params(k_p, F, H)

    out = hybrid_headed_forward(x, params)
    out = jax.block_until_ready(out)

    ref = reference_forward(x, params)
    assert out.shape == (B, 1)
    err = float(jnp.max(jnp.abs(out - ref)))
    assert err < 1e-3, f"mismatch vs reference: {err}"
    print("KERNEL_OK")
</pallas_src>

<mosaic_0001>
module attributes {stable_mosaic.version = 11 : i64} {
  func.func @lstm_head_kernel(%arg0: i32, %arg1: memref<8x8x8xf32, #tpu.memory_space<vmem>>, %arg2: memref<8x128xbf16, #tpu.memory_space<vmem>>, %arg3: memref<1x128xf32, #tpu.memory_space<vmem>>, %arg4: memref<32x128xbf16, #tpu.memory_space<vmem>>, %arg5: memref<32x16xf32, #tpu.memory_space<vmem>>, %arg6: memref<1x128xf32, #tpu.memory_space<vmem>>, %arg7: memref<8x1xf32, #tpu.memory_space<vmem>>, %arg8: memref<8x32xf32, #tpu.memory_space<vmem>>, %arg9: memref<8x32xf32, #tpu.memory_space<vmem>>, %arg10: memref<8x8x128xf32, #tpu.memory_space<vmem>>) attributes {dimension_semantics = [#tpu.dimension_semantics<arbitrary>], iteration_bounds = array<i64: 1>, scalar_prefetch = 0 : i64, scratch_operands = 3 : i64, tpu.core_type = #tpu.core_type<tc>, window_params = [{transform_indices = @transform_0, window_bounds = array<i64: 8, 8, 8>}, {pipeline_mode = #tpu.pipeline_mode<synchronous>, transform_indices = @transform_1, window_bounds = array<i64: 8, 128>}, {pipeline_mode = #tpu.pipeline_mode<synchronous>, transform_indices = @transform_2, window_bounds = array<i64: 1, 128>}, {pipeline_mode = #tpu.pipeline_mode<synchronous>, transform_indices = @transform_3, window_bounds = array<i64: 32, 128>}, {pipeline_mode = #tpu.pipeline_mode<synchronous>, transform_indices = @transform_4, window_bounds = array<i64: 32, 16>}, {pipeline_mode = #tpu.pipeline_mode<synchronous>, transform_indices = @transform_5, window_bounds = array<i64: 1, 128>}, {pipeline_mode = #tpu.pipeline_mode<synchronous>, transform_indices = @transform_6, window_bounds = array<i64: 8, 1>}]} {
    %c0_i32 = arith.constant 0 : i32
    %0 = arith.cmpi eq, %arg0, %c0_i32 : i32
    %1 = arith.extui %0 : i1 to i32
    %c0_i32_0 = arith.constant 0 : i32
    %2 = arith.cmpi ne, %1, %c0_i32_0 : i32
    scf.if %2 {
      %cst_55 = arith.constant 0.000000e+00 : f32
      %189 = vector.broadcast %cst_55 : f32 to vector<8x32xf32>
      %c0_56 = arith.constant 0 : index
      %c0_57 = arith.constant 0 : index
      %190 = vector.load %arg8[%c0_56, %c0_57] : memref<8x32xf32, #tpu.memory_space<vmem>>, vector<8x32xf32>
      tpu.vector_store %arg8[%c0_56, %c0_57], %189 {strides = array<i32>} : memref<8x32xf32, #tpu.memory_space<vmem>>, vector<8x32xf32>,
      %cst_58 = arith.constant 0.000000e+00 : f32
      %191 = vector.broadcast %cst_58 : f32 to vector<8x32xf32>
      %c0_59 = arith.constant 0 : index
      %c0_60 = arith.constant 0 : index
      %192 = vector.load %arg9[%c0_59, %c0_60] : memref<8x32xf32, #tpu.memory_space<vmem>>, vector<8x32xf32>
      tpu.vector_store %arg9[%c0_59, %c0_60], %191 {strides = array<i32>} : memref<8x32xf32, #tpu.memory_space<vmem>>, vector<8x32xf32>,
    } else {
    }
    %c0 = arith.constant 0 : index
    %c0_1 = arith.constant 0 : index
    %c0_2 = arith.constant 0 : index
    %3 = vector.load %arg1[%c0, %c0_1, %c0_2] : memref<8x8x8xf32, #tpu.memory_space<vmem>>, vector<8x8x8xf32>
    %4 = vector.shape_cast %3 : vector<8x8x8xf32> to vector<64x8xf32>
    %5 = arith.truncf %4 : vector<64x8xf32> to vector<64x8xbf16>
    %c0_3 = arith.constant 0 : index
    %c0_4 = arith.constant 0 : index
    %6 = vector.load %arg2[%c0_3, %c0_4] : memref<8x128xbf16, #tpu.memory_space<vmem>>, vector<8x128xbf16>
    %cst = arith.constant dense<0.000000e+00> : vector<64x128xf32>
    %7 = tpu.matmul %5, %6, %cst {dimension_numbers = #tpu.dot_dimension_numbers<[1], [0], [0], [1], [0, 0, 1, 1], [], []>} : vector<64x8xbf16>, vector<8x128xbf16>, vector<64x128xf32> -> vector<64x128xf32>
    %c0_5 = arith.constant 0 : index
    %c0_6 = arith.constant 0 : index
    %8 = vector.load %arg3[%c0_5, %c0_6] : memref<1x128xf32, #tpu.memory_space<vmem>>, vector<1x128xf32>
    %9 = vector.broadcast %8 : vector<1x128xf32> to vector<64x128xf32>
    %10 = arith.addf %7, %9 : vector<64x128xf32>
    %11 = vector.shape_cast %10 : vector<64x128xf32> to vector<8x8x128xf32>
    %c0_7 = arith.constant 0 : index
    %c0_8 = arith.constant 0 : index
    %c0_9 = arith.constant 0 : index
    %12 = vector.load %arg10[%c0_7, %c0_8, %c0_9] : memref<8x8x128xf32, #tpu.memory_space<vmem>>, vector<8x8x128xf32>
    tpu.vector_store %arg10[%c0_7, %c0_8, %c0_9], %11 {strides = array<i32>} : memref<8x8x128xf32, #tpu.memory_space<vmem>>, vector<8x8x128xf32>,
    %c0_10 = arith.constant 0 : index
    %c0_11 = arith.constant 0 : index
    %13 = vector.load %arg4[%c0_10, %c0_11] : memref<32x128xbf16, #tpu.memory_space<vmem>>, vector<32x128xbf16>
    %c0_12 = arith.constant 0 : index
    %c0_13 = arith.constant 0 : index
    %14 = vector.load %arg8[%c0_12, %c0_13] : memref<8x32xf32, #tpu.memory_space<vmem>>, vector<8x32xf32>
    %c0_14 = arith.constant 0 : index
    %c0_15 = arith.constant 0 : index
    %15 = vector.load %arg9[%c0_14, %c0_15] : memref<8x32xf32, #tpu.memory_space<vmem>>, vector<8x32xf32>
    %c0_i32_16 = arith.constant 0 : i32
    %16 = arith.index_cast %c0_i32_16 : i32 to index
    %c0_17 = arith.constant 0 : index
    %c0_18 = arith.constant 0 : index
    %17 = vector.load %arg10[%16, %c0_17, %c0_18] : memref<8x8x128xf32, #tpu.memory_space<vmem>>, vector<1x8x128xf32>
    %18 = vector.shape_cast %17 : vector<1x8x128xf32> to vector<8x128xf32>
    %19 = arith.truncf %14 : vector<8x32xf32> to vector<8x32xbf16>
    %cst_19 = arith.constant dense<0.000000e+00> : vector<8x128xf32>
    %20 = tpu.matmul %19, %13, %cst_19 {dimension_numbers = #tpu.dot_dimension_numbers<[1], [0], [0], [1], [0, 0, 1, 1], [], []>} : vector<8x32xbf16>, vector<32x128xbf16>, vector<8x128xf32> -> vector<8x128xf32>
    %21 = arith.addf %18, %20 : vector<8x128xf32>
    %22 = arith.negf %21 : vector<8x128xf32>
    %23 = math.exp %22 : vector<8x128xf32>
    %cst_20 = arith.constant 1.000000e+00 : f32
    %24 = vector.broadcast %cst_20 : f32 to vector<8x128xf32>
    %25 = arith.addf %24, %23 : vector<8x128xf32>
    %26 = arith.divf %24, %25 : vector<8x128xf32>
    %27 = math.tanh %21 : vector<8x128xf32>
    %28 = vector.extract_strided_slice %26 {offsets = [0, 0], sizes = [8, 32], strides = [1, 1]} : vector<8x128xf32> to vector<8x32xf32>
    %29 = vector.extract_strided_slice %26 {offsets = [0, 32], sizes = [8, 32], strides = [1, 1]} : vector<8x128xf32> to vector<8x32xf32>
    %30 = vector.extract_strided_slice %27 {offsets = [0, 64], sizes = [8, 32], strides = [1, 1]} : vector<8x128xf32> to vector<8x32xf32>
    %31 = vector.extract_strided_slice %26 {offsets = [0, 96], sizes = [8, 32], strides = [1, 1]} : vector<8x128xf32> to vector<8x32xf32>
    %32 = arith.mulf %29, %15 : vector<8x32xf32>
    %33 = arith.mulf %28, %30 : vector<8x32xf32>
    %34 = arith.addf %32, %33 : vector<8x32xf32>
    %35 = math.tanh %34 : vector<8x32xf32>
    %36 = arith.mulf %31, %35 : vector<8x32xf32>
    %c1_i32 = arith.constant 1 : i32
    %37 = arith.index_cast %c1_i32 : i32 to index
    %c0_21 = arith.constant 0 : index
    %c0_22 = arith.constant 0 : index
    %38 = vector.load %arg10[%37, %c0_21, %c0_22] : memref<8x8x128xf32, #tpu.memory_space<vmem>>, vector<1x8x128xf32>
    %39 = vector.shape_cast %38 : vector<1x8x128xf32> to vector<8x128xf32>
    %40 = arith.truncf %36 : vector<8x32xf32> to vector<8x32xbf16>
    %cst_23 = arith.constant dense<0.000000e+00> : vector<8x128xf32>
    %41 = tpu.matmul %40, %13, %cst_23 {dimension_numbers = #tpu.dot_dimension_numbers<[1], [0], [0], [1], [0, 0, 1, 1], [], []>} : vector<8x32xbf16>, vector<32x128xbf16>, vector<8x128xf32> -> vector<8x128xf32>
    %42 = arith.addf %39, %41 : vector<8x128xf32>
    %43 = arith.negf %42 : vector<8x128xf32>
    %44 = math.exp %43 : vector<8x128xf32>
    %cst_24 = arith.constant 1.000000e+00 : f32
    %45 = vector.broadcast %cst_24 : f32 to vector<8x128xf32>
    %46 = arith.addf %45, %44 : vector<8x128xf32>
    %47 = arith.divf %45, %46 : vector<8x128xf32>
    %48 = math.tanh %42 : vector<8x128xf32>
    %49 = vector.extract_strided_slice %47 {offsets = [0, 0], sizes = [8, 32], strides = [1, 1]} : vector<8x128xf32> to vector<8x32xf32>
    %50 = vector.extract_strided_slice %47 {offsets = [0, 32], sizes = [8, 32], strides = [1, 1]} : vector<8x128xf32> to vector<8x32xf32>
    %51 = vector.extract_strided_slice %48 {offsets = [0, 64], sizes = [8, 32], strides = [1, 1]} : vector<8x128xf32> to vector<8x32xf32>
    %52 = vector.extract_strided_slice %47 {offsets = [0, 96], sizes = [8, 32], strides = [1, 1]} : vector<8x128xf32> to vector<8x32xf32>
    %53 = arith.mulf %50, %34 : vector<8x32xf32>
    %54 = arith.mulf %49, %51 : vector<8x32xf32>
    %55 = arith.addf %53, %54 : vector<8x32xf32>
    %56 = math.tanh %55 : vector<8x32xf32>
    %57 = arith.mulf %52, %56 : vector<8x32xf32>
    %c2_i32 = arith.constant 2 : i32
    %58 = arith.index_cast %c2_i32 : i32 to index
    %c0_25 = arith.constant 0 : index
    %c0_26 = arith.constant 0 : index
    %59 = vector.load %arg10[%58, %c0_25, %c0_26] : memref<8x8x128xf32, #tpu.memory_space<vmem>>, vector<1x8x128xf32>
    %60 = vector.shape_cast %59 : vector<1x8x128xf32> to vector<8x128xf32>
    %61 = arith.truncf %57 : vector<8x32xf32> to vector<8x32xbf16>
    %cst_27 = arith.constant dense<0.000000e+00> : vector<8x128xf32>
    %62 = tpu.matmul %61, %13, %cst_27 {dimension_numbers = #tpu.dot_dimension_numbers<[1], [0], [0], [1], [0, 0, 1, 1], [], []>} : vector<8x32xbf16>, vector<32x128xbf16>, vector<8x128xf32> -> vector<8x128xf32>
    %63 = arith.addf %60, %62 : vector<8x128xf32>
    %64 = arith.negf %63 : vector<8x128xf32>
    %65 = math.exp %64 : vector<8x128xf32>
    %cst_28 = arith.constant 1.000000e+00 : f32
    %66 = vector.broadcast %cst_28 : f32 to vector<8x128xf32>
    %67 = arith.addf %66, %65 : vector<8x128xf32>
    %68 = arith.divf %66, %67 : vector<8x128xf32>
    %69 = math.tanh %63 : vector<8x128xf32>
    %70 = vector.extract_strided_slice %68 {offsets = [0, 0], sizes = [8, 32], strides = [1, 1]} : vector<8x128xf32> to vector<8x32xf32>
    %71 = vector.extract_strided_slice %68 {offsets = [0, 32], sizes = [8, 32], strides = [1, 1]} : vector<8x128xf32> to vector<8x32xf32>
    %72 = vector.extract_strided_slice %69 {offsets = [0, 64], sizes = [8, 32], strides = [1, 1]} : vector<8x128xf32> to vector<8x32xf32>
    %73 = vector.extract_strided_slice %68 {offsets = [0, 96], sizes = [8, 32], strides = [1, 1]} : vector<8x128xf32> to vector<8x32xf32>
    %74 = arith.mulf %71, %55 : vector<8x32xf32>
    %75 = arith.mulf %70, %72 : vector<8x32xf32>
    %76 = arith.addf %74, %75 : vector<8x32xf32>
    %77 = math.tanh %76 : vector<8x32xf32>
    %78 = arith.mulf %73, %77 : vector<8x32xf32>
    %c3_i32 = arith.constant 3 : i32
    %79 = arith.index_cast %c3_i32 : i32 to index
    %c0_29 = arith.constant 0 : index
    %c0_30 = arith.constant 0 : index
    %80 = vector.load %arg10[%79, %c0_29, %c0_30] : memref<8x8x128xf32, #tpu.memory_space<vmem>>, vector<1x8x128xf32>
    %81 = vector.shape_cast %80 : vector<1x8x128xf32> to vector<8x128xf32>
    %82 = arith.truncf %78 : vector<8x32xf32> to vector<8x32xbf16>
    %cst_31 = arith.constant dense<0.000000e+00> : vector<8x128xf32>
    %83 = tpu.matmul %82, %13, %cst_31 {dimension_numbers = #tpu.dot_dimension_numbers<[1], [0], [0], [1], [0, 0, 1, 1], [], []>} : vector<8x32xbf16>, vector<32x128xbf16>, vector<8x128xf32> -> vector<8x128xf32>
    %84 = arith.addf %81, %83 : vector<8x128xf32>
    %85 = arith.negf %84 : vector<8x128xf32>
    %86 = math.exp %85 : vector<8x128xf32>
    %cst_32 = arith.constant 1.000000e+00 : f32
    %87 = vector.broadcast %cst_32 : f32 to vector<8x128xf32>
    %88 = arith.addf %87, %86 : vector<8x128xf32>
    %89 = arith.divf %87, %88 : vector<8x128xf32>
    %90 = math.tanh %84 : vector<8x128xf32>
    %91 = vector.extract_strided_slice %89 {offsets = [0, 0], sizes = [8, 32], strides = [1, 1]} : vector<8x128xf32> to vector<8x32xf32>
    %92 = vector.extract_strided_slice %89 {offsets = [0, 32], sizes = [8, 32], strides = [1, 1]} : vector<8x128xf32> to vector<8x32xf32>
    %93 = vector.extract_strided_slice %90 {offsets = [0, 64], sizes = [8, 32], strides = [1, 1]} : vector<8x128xf32> to vector<8x32xf32>
    %94 = vector.extract_strided_slice %89 {offsets = [0, 96], sizes = [8, 32], strides = [1, 1]} : vector<8x128xf32> to vector<8x32xf32>
    %95 = arith.mulf %92, %76 : vector<8x32xf32>
    %96 = arith.mulf %91, %93 : vector<8x32xf32>
    %97 = arith.addf %95, %96 : vector<8x32xf32>
    %98 = math.tanh %97 : vector<8x32xf32>
    %99 = arith.mulf %94, %98 : vector<8x32xf32>
    %c4_i32 = arith.constant 4 : i32
    %100 = arith.index_cast %c4_i32 : i32 to index
    %c0_33 = arith.constant 0 : index
    %c0_34 = arith.constant 0 : index
    %101 = vector.load %arg10[%100, %c0_33, %c0_34] : memref<8x8x128xf32, #tpu.memory_space<vmem>>, vector<1x8x128xf32>
    %102 = vector.shape_cast %101 : vector<1x8x128xf32> to vector<8x128xf32>
    %103 = arith.truncf %99 : vector<8x32xf32> to vector<8x32xbf16>
    %cst_35 = arith.constant dense<0.000000e+00> : vector<8x128xf32>
    %104 = tpu.matmul %103, %13, %cst_35 {dimension_numbers = #tpu.dot_dimension_numbers<[1], [0], [0], [1], [0, 0, 1, 1], [], []>} : vector<8x32xbf16>, vector<32x128xbf16>, vector<8x128xf32> -> vector<8x128xf32>
    %105 = arith.addf %102, %104 : vector<8x128xf32>
    %106 = arith.negf %105 : vector<8x128xf32>
    %107 = math.exp %106 : vector<8x128xf32>
    %cst_36 = arith.constant 1.000000e+00 : f32
    %108 = vector.broadcast %cst_36 : f32 to vector<8x128xf32>
    %109 = arith.addf %108, %107 : vector<8x128xf32>
    %110 = arith.divf %108, %109 : vector<8x128xf32>
    %111 = math.tanh %105 : vector<8x128xf32>
    %112 = vector.extract_strided_slice %110 {offsets = [0, 0], sizes = [8, 32], strides = [1, 1]} : vector<8x128xf32> to vector<8x32xf32>
    %113 = vector.extract_strided_slice %110 {offsets = [0, 32], sizes = [8, 32], strides = [1, 1]} : vector<8x128xf32> to vector<8x32xf32>
    %114 = vector.extract_strided_slice %111 {offsets = [0, 64], sizes = [8, 32], strides = [1, 1]} : vector<8x128xf32> to vector<8x32xf32>
    %115 = vector.extract_strided_slice %110 {offsets = [0, 96], sizes = [8, 32], strides = [1, 1]} : vector<8x128xf32> to vector<8x32xf32>
    %116 = arith.mulf %113, %97 : vector<8x32xf32>
    %117 = arith.mulf %112, %114 : vector<8x32xf32>
    %118 = arith.addf %116, %117 : vector<8x32xf32>
    %119 = math.tanh %118 : vector<8x32xf32>
    %120 = arith.mulf %115, %119 : vector<8x32xf32>
    %c5_i32 = arith.constant 5 : i32
    %121 = arith.index_cast %c5_i32 : i32 to index
    %c0_37 = arith.constant 0 : index
    %c0_38 = arith.constant 0 : index
    %122 = vector.load %arg10[%121, %c0_37, %c0_38] : memref<8x8x128xf32, #tpu.memory_space<vmem>>, vector<1x8x128xf32>
    %123 = vector.shape_cast %122 : vector<1x8x128xf32> to vector<8x128xf32>
    %124 = arith.truncf %120 : vector<8x32xf32> to vector<8x32xbf16>
    %cst_39 = arith.constant dense<0.000000e+00> : vector<8x128xf32>
    %125 = tpu.matmul %124, %13, %cst_39 {dimension_numbers = #tpu.dot_dimension_numbers<[1], [0], [0], [1], [0, 0, 1, 1], [], []>} : vector<8x32xbf16>, vector<32x128xbf16>, vector<8x128xf32> -> vector<8x128xf32>
    %126 = arith.addf %123, %125 : vector<8x128xf32>
    %127 = arith.negf %126 : vector<8x128xf32>
    %128 = math.exp %127 : vector<8x128xf32>
    %cst_40 = arith.constant 1.000000e+00 : f32
    %129 = vector.broadcast %cst_40 : f32 to vector<8x128xf32>
    %130 = arith.addf %129, %128 : vector<8x128xf32>
    %131 = arith.divf %129, %130 : vector<8x128xf32>
    %132 = math.tanh %126 : vector<8x128xf32>
    %133 = vector.extract_strided_slice %131 {offsets = [0, 0], sizes = [8, 32], strides = [1, 1]} : vector<8x128xf32> to vector<8x32xf32>
    %134 = vector.extract_strided_slice %131 {offsets = [0, 32], sizes = [8, 32], strides = [1, 1]} : vector<8x128xf32> to vector<8x32xf32>
    %135 = vector.extract_strided_slice %132 {offsets = [0, 64], sizes = [8, 32], strides = [1, 1]} : vector<8x128xf32> to vector<8x32xf32>
    %136 = vector.extract_strided_slice %131 {offsets = [0, 96], sizes = [8, 32], strides = [1, 1]} : vector<8x128xf32> to vector<8x32xf32>
    %137 = arith.mulf %134, %118 : vector<8x32xf32>
    %138 = arith.mulf %133, %135 : vector<8x32xf32>
    %139 = arith.addf %137, %138 : vector<8x32xf32>
    %140 = math.tanh %139 : vector<8x32xf32>
    %141 = arith.mulf %136, %140 : vector<8x32xf32>
    %c6_i32 = arith.constant 6 : i32
    %142 = arith.index_cast %c6_i32 : i32 to index
    %c0_41 = arith.constant 0 : index
    %c0_42 = arith.constant 0 : index
    %143 = vector.load %arg10[%142, %c0_41, %c0_42] : memref<8x8x128xf32, #tpu.memory_space<vmem>>, vector<1x8x128xf32>
    %144 = vector.shape_cast %143 : vector<1x8x128xf32> to vector<8x128xf32>
    %145 = arith.truncf %141 : vector<8x32xf32> to vector<8x32xbf16>
    %cst_43 = arith.constant dense<0.000000e+00> : vector<8x128xf32>
    %146 = tpu.matmul %145, %13, %cst_43 {dimension_numbers = #tpu.dot_dimension_numbers<[1], [0], [0], [1], [0, 0, 1, 1], [], []>} : vector<8x32xbf16>, vector<32x128xbf16>, vector<8x128xf32> -> vector<8x128xf32>
    %147 = arith.addf %144, %146 : vector<8x128xf32>
    %148 = arith.negf %147 : vector<8x128xf32>
    %149 = math.exp %148 : vector<8x128xf32>
    %cst_44 = arith.constant 1.000000e+00 : f32
    %150 = vector.broadcast %cst_44 : f32 to vector<8x128xf32>
    %151 = arith.addf %150, %149 : vector<8x128xf32>
    %152 = arith.divf %150, %151 : vector<8x128xf32>
    %153 = math.tanh %147 : vector<8x128xf32>
    %154 = vector.extract_strided_slice %152 {offsets = [0, 0], sizes = [8, 32], strides = [1, 1]} : vector<8x128xf32> to vector<8x32xf32>
    %155 = vector.extract_strided_slice %152 {offsets = [0, 32], sizes = [8, 32], strides = [1, 1]} : vector<8x128xf32> to vector<8x32xf32>
    %156 = vector.extract_strided_slice %153 {offsets = [0, 64], sizes = [8, 32], strides = [1, 1]} : vector<8x128xf32> to vector<8x32xf32>
    %157 = vector.extract_strided_slice %152 {offsets = [0, 96], sizes = [8, 32], strides = [1, 1]} : vector<8x128xf32> to vector<8x32xf32>
    %158 = arith.mulf %155, %139 : vector<8x32xf32>
    %159 = arith.mulf %154, %156 : vector<8x32xf32>
    %160 = arith.addf %158, %159 : vector<8x32xf32>
    %161 = math.tanh %160 : vector<8x32xf32>
    %162 = arith.mulf %157, %161 : vector<8x32xf32>
    %c7_i32 = arith.constant 7 : i32
    %163 = arith.index_cast %c7_i32 : i32 to index
    %c0_45 = arith.constant 0 : index
    %c0_46 = arith.constant 0 : index
    %164 = vector.load %arg10[%163, %c0_45, %c0_46] : memref<8x8x128xf32, #tpu.memory_space<vmem>>, vector<1x8x128xf32>
    %165 = vector.shape_cast %164 : vector<1x8x128xf32> to vector<8x128xf32>
    %166 = arith.truncf %162 : vector<8x32xf32> to vector<8x32xbf16>
    %cst_47 = arith.constant dense<0.000000e+00> : vector<8x128xf32>
    %167 = tpu.matmul %166, %13, %cst_47 {dimension_numbers = #tpu.dot_dimension_numbers<[1], [0], [0], [1], [0, 0, 1, 1], [], []>} : vector<8x32xbf16>, vector<32x128xbf16>, vector<8x128xf32> -> vector<8x128xf32>
    %168 = arith.addf %165, %167 : vector<8x128xf32>
    %169 = arith.negf %168 : vector<8x128xf32>
    %170 = math.exp %169 : vector<8x128xf32>
    %cst_48 = arith.constant 1.000000e+00 : f32
    %171 = vector.broadcast %cst_48 : f32 to vector<8x128xf32>
    %172 = arith.addf %171, %170 : vector<8x128xf32>
    %173 = arith.divf %171, %172 : vector<8x128xf32>
    %174 = math.tanh %168 : vector<8x128xf32>
    %175 = vector.extract_strided_slice %173 {offsets = [0, 0], sizes = [8, 32], strides = [1, 1]} : vector<8x128xf32> to vector<8x32xf32>
    %176 = vector.extract_strided_slice %173 {offsets = [0, 32], sizes = [8, 32], strides = [1, 1]} : vector<8x128xf32> to vector<8x32xf32>
    %177 = vector.extract_strided_slice %174 {offsets = [0, 64], sizes = [8, 32], strides = [1, 1]} : vector<8x128xf32> to vector<8x32xf32>
    %178 = vector.extract_strided_slice %173 {offsets = [0, 96], sizes = [8, 32], strides = [1, 1]} : vector<8x128xf32> to vector<8x32xf32>
    %179 = arith.mulf %176, %160 : vector<8x32xf32>
    %180 = arith.mulf %175, %177 : vector<8x32xf32>
    %181 = arith.addf %179, %180 : vector<8x32xf32>
    %182 = math.tanh %181 : vector<8x32xf32>
    %183 = arith.mulf %178, %182 : vector<8x32xf32>
    %c8_i32 = arith.constant 8 : i32
    %c0_49 = arith.constant 0 : index
    %c0_50 = arith.constant 0 : index
    %184 = vector.load %arg8[%c0_49, %c0_50] : memref<8x32xf32, #tpu.memory_space<vmem>>, vector<8x32xf32>
    tpu.vector_store %arg8[%c0_49, %c0_50], %183 {strides = array<i32>} : memref<8x32xf32, #tpu.memory_space<vmem>>, vector<8x32xf32>,
    %c0_51 = arith.constant 0 : index
    %c0_52 = arith.constant 0 : index
    %185 = vector.load %arg9[%c0_51, %c0_52] : memref<8x32xf32, #tpu.memory_space<vmem>>, vector<8x32xf32>
    tpu.vector_store %arg9[%c0_51, %c0_52], %181 {strides = array<i32>} : memref<8x32xf32, #tpu.memory_space<vmem>>, vector<8x32xf32>,
    %c0_i32_53 = arith.constant 0 : i32
    %186 = arith.cmpi eq, %arg0, %c0_i32_53 : i32
    %187 = arith.extui %186 : i1 to i32
    %c0_i32_54 = arith.constant 0 : i32
    %188 = arith.cmpi ne, %187, %c0_i32_54 : i32
    scf.if %188 {
      %c0_55 = arith.constant 0 : index
      %c0_56 = arith.constant 0 : index
      %189 = vector.load %arg6[%c0_55, %c0_56] : memref<1x128xf32, #tpu.memory_space<vmem>>, vector<1x128xf32>
      %190 = vector.extract_strided_slice %189 {offsets = [0, 0], sizes = [1, 32], strides = [1, 1]} : vector<1x128xf32> to vector<1x32xf32>
      %191 = vector.extract_strided_slice %189 {offsets = [0, 32], sizes = [1, 32], strides = [1, 1]} : vector<1x128xf32> to vector<1x32xf32>
      %192 = vector.extract_strided_slice %189 {offsets = [0, 64], sizes = [1, 16], strides = [1, 1]} : vector<1x128xf32> to vector<1x16xf32>
      %193 = vector.extract_strided_slice %189 {offsets = [0, 80], sizes = [1, 16], strides = [1, 1]} : vector<1x128xf32> to vector<1x16xf32>
      %194 = vector.extract_strided_slice %189 {offsets = [0, 96], sizes = [1, 1], strides = [1, 1]} : vector<1x128xf32> to vector<1x1xf32>
      %cst_57 = arith.constant dense<0.000000e+00> : vector<8xf32>
      %195 = vector.multi_reduction <add>, %183, %cst_57 [1] : vector<8x32xf32> to vector<8xf32>
      %196 = vector.shape_cast %195 : vector<8xf32> to vector<8x1xf32>
      %cst_58 = arith.constant 3.200000e+01 : f32
      %197 = vector.broadcast %cst_58 : f32 to vector<8x1xf32>
      %198 = arith.divf %196, %197 : vector<8x1xf32>
      %199 = vector.broadcast %198 : vector<8x1xf32> to vector<8x32xf32>
      %200 = arith.subf %183, %199 : vector<8x32xf32>
      %201 = arith.mulf %200, %200 : vector<8x32xf32>
      %cst_59 = arith.constant dense<0.000000e+00> : vector<8xf32>
      %202 = vector.multi_reduction <add>, %201, %cst_59 [1] : vector<8x32xf32> to vector<8xf32>
      %203 = vector.shape_cast %202 : vector<8xf32> to vector<8x1xf32>
      %cst_60 = arith.constant 3.200000e+01 : f32
      %204 = vector.broadcast %cst_60 : f32 to vector<8x1xf32>
      %205 = arith.divf %203, %204 : vector<8x1xf32>
      %206 = vector.broadcast %198 : vector<8x1xf32> to vector<8x32xf32>
      %207 = arith.subf %183, %206 : vector<8x32xf32>
      %cst_61 = arith.constant 9.99999974E-6 : f32
      %208 = vector.broadcast %cst_61 : f32 to vector<8x1xf32>
      %209 = arith.addf %205, %208 : vector<8x1xf32>
      %210 = math.rsqrt %209 : vector<8x1xf32>
      %211 = vector.broadcast %210 : vector<8x1xf32> to vector<8x32xf32>
      %212 = arith.mulf %207, %211 : vector<8x32xf32>
      %213 = vector.broadcast %190 : vector<1x32xf32> to vector<8x32xf32>
      %214 = arith.mulf %212, %213 : vector<8x32xf32>
      %215 = vector.broadcast %191 : vector<1x32xf32> to vector<8x32xf32>
      %216 = arith.addf %214, %215 : vector<8x32xf32>
      %c0_62 = arith.constant 0 : index
      %c0_63 = arith.constant 0 : index
      %217 = vector.load %arg5[%c0_62, %c0_63] : memref<32x16xf32, #tpu.memory_space<vmem>>, vector<32x16xf32>
      %cst_64 = arith.constant dense<0.000000e+00> : vector<8x16xf32>
      %218 = tpu.matmul %216, %217, %cst_64 {dimension_numbers = #tpu.dot_dimension_numbers<[1], [0], [0], [1], [0, 0, 1, 1], [], []>} : vector<8x32xf32>, vector<32x16xf32>, vector<8x16xf32> -> vector<8x16xf32>
      %219 = vector.broadcast %192 : vector<1x16xf32> to vector<8x16xf32>
      %220 = arith.addf %218, %219 : vector<8x16xf32>
      %cst_65 = arith.constant 0.000000e+00 : f32
      %221 = vector.broadcast %cst_65 : f32 to vector<8x16xf32>
      %222 = arith.maximumf %220, %221 : vector<8x16xf32>
      %223 = vector.broadcast %193 : vector<1x16xf32> to vector<8x16xf32>
      %224 = arith.mulf %222, %223 : vector<8x16xf32>
      %cst_66 = arith.constant dense<0.000000e+00> : vector<8xf32>
      %225 = vector.multi_reduction <add>, %224, %cst_66 [1] : vector<8x16xf32> to vector<8xf32>
      %226 = vector.shape_cast %225 : vector<8xf32> to vector<8x1xf32>
      %227 = vector.broadcast %194 : vector<1x1xf32> to vector<8x1xf32>
      %228 = arith.addf %226, %227 : vector<8x1xf32>
      %229 = arith.negf %228 : vector<8x1xf32>
      %230 = math.exp %229 : vector<8x1xf32>
      %cst_67 = arith.constant 1.000000e+00 : f32
      %231 = vector.broadcast %cst_67 : f32 to vector<8x1xf32>
      %232 = arith.addf %231, %230 : vector<8x1xf32>
      %233 = arith.divf %231, %232 : vector<8x1xf32>
      %c0_68 = arith.constant 0 : index
      %c0_69 = arith.constant 0 : index
      %234 = vector.load %arg7[%c0_68, %c0_69] : memref<8x1xf32, #tpu.memory_space<vmem>>, vector<8x1xf32>
      tpu.vector_store %arg7[%c0_68, %c0_69], %233 {strides = array<i32>} : memref<8x1xf32, #tpu.memory_space<vmem>>, vector<8x1xf32>,
    } else {
    }
    return
  }
  func.func @transform_0(%arg0: i32) -> (i32, i32, i32) {
    %c0_i32 = arith.constant 0 : i32
    %c0_i32_0 = arith.constant 0 : i32
    %c0_i32_1 = arith.constant 0 : i32
    return %arg0, %c0_i32, %c0_i32_0 : i32, i32, i32
  }
  func.func @transform_1(%arg0: i32) -> (i32, i32) {
    %c0_i32 = arith.constant 0 : i32
    %c0_i32_0 = arith.constant 0 : i32
    %c0_i32_1 = arith.constant 0 : i32
    return %c0_i32, %c0_i32_0 : i32, i32
  }
  func.func @transform_2(%arg0: i32) -> (i32, i32) {
    %c0_i32 = arith.constant 0 : i32
    %c0_i32_0 = arith.constant 0 : i32
    %c0_i32_1 = arith.constant 0 : i32
    return %c0_i32, %c0_i32_0 : i32, i32
  }
  func.func @transform_3(%arg0: i32) -> (i32, i32) {
    %c0_i32 = arith.constant 0 : i32
    %c0_i32_0 = arith.constant 0 : i32
    %c0_i32_1 = arith.constant 0 : i32
    return %c0_i32, %c0_i32_0 : i32, i32
  }
  func.func @transform_4(%arg0: i32) -> (i32, i32) {
    %c0_i32 = arith.constant 0 : i32
    %c0_i32_0 = arith.constant 0 : i32
    %c0_i32_1 = arith.constant 0 : i32
    return %c0_i32, %c0_i32_0 : i32, i32
  }
  func.func @transform_5(%arg0: i32) -> (i32, i32) {
    %c0_i32 = arith.constant 0 : i32
    %c0_i32_0 = arith.constant 0 : i32
    %c0_i32_1 = arith.constant 0 : i32
    return %c0_i32, %c0_i32_0 : i32, i32
  }
  func.func @transform_6(%arg0: i32) -> (i32, i32) {
    %c0_i32 = arith.constant 0 : i32
    %c0_i32_0 = arith.constant 0 : i32
    %c0_i32_1 = arith.constant 0 : i32
    return %c0_i32, %c0_i32_0 : i32, i32
  }
}

</mosaic_0001>

<bundles_post_ra>
// kernel: tpu_custom_call.1
= control target key start
LH: loop header
LB: loop body
LE: loop exit
PB: predicated region body
PF: predicated region fallthrough
CT: control target
= control target key end

     0   :  { %11 = vsyncpa [#allocation6], 0  ;;  %s1176_s21 = smov [#allocation5]   ;;  %s1405_s0 = inlined_call_operand.hbm [shape: f32[8,8,8], index: 0, kind: input, shape index: {}]   ;;  %s1406_s1 = inlined_call_operand.vmem [shape: bf16[8,128], index: 1, kind: input, shape index: {}]   ;;  %s1407_s2 = inlined_call_operand.vmem [shape: f32[1,128], index: 2, kind: input, shape index: {}]   ;;  %s1408_s3 = inlined_call_operand.vmem [shape: bf16[32,128], index: 3, kind: input, shape index: {}]   ;;  %s1409_s4 = inlined_call_operand.vmem [shape: f32[32,16], index: 4, kind: input, shape index: {}]   ;;  %s1410_s5 = inlined_call_operand.vmem [shape: f32[1,128], index: 5, kind: input, shape index: {}]   ;;  %s1411_s6 = inlined_call_operand.vmem [shape: f32[8,1], index: 6, kind: output, shape index: {}]  }
   0x1   :  { %s17_s22 = sshll.u32 %s1176_s21, 4  ;;  %s1152_s25 = scalar_lea.hbm %s1405_s0, 1024  ;;  %s18_s22 = int_to_ptr.vmem [resolvable:$true] %s17_s22 }
   0x2   :  { %p1153_p0 = scmp.ne.s32.totalorder %s1405_s0, %s1152_s25  ;;  %p1156_p1 = scmp.lt.u32.totalorder %s1152_s25, %s1405_s0 }
   0x4   :  { %p1158_p2 = pnand %p1156_p1, %p1153_p0 }
   0x6   :  { %1161 = shalt.err (!%p1158_p2)
}
   0x7   :  { %s1162_s30 = scalar_lea.vmem %s18_s22, 1024  ;;  %p1167_p4 = scmp.lt.s32.totalorder %s18_s22, %s18_s22 }
   0x8   :  { %p1163_p3 = scmp.ne.s32.totalorder %s18_s22, %s1162_s30  ;;  %p1168_p5 = scmp.lt.s32.totalorder %s1162_s30, %s1162_s30 }
   0xa   :  { %p1169_p6 = por %p1168_p5, %p1167_p4 }
   0xc   :  { %p1170_p7 = pnand %p1169_p6, %p1163_p3 }
   0xe   :  { %1173 = shalt.err (!%p1170_p7)
}
   0xf   :  { %s1177_s7 = smov 128   ;;  %s1178_s8 = smov 8  }
  0x10   :  { %23 = dma.hbm_to_vmem [thread:$0]  %s1405_s0, 1024, %s18_s22, [#allocation6], %s1177_s7, %s1177_s7, %s1178_s8  }
  0x11   :  { %1174 = dma.done.wait [#allocation6], 1024  }
  0x12   :  { %1175 = vsyncadd [#allocation6], 4294966272  ;;  %v1179_v0 = vmov 0.0   ;;  %vm1180_vm0 = vmmov 0   ;;  %vm42_vm1 = vcmask 261120   ;;  %vm78_vm2 = vcmask 1043456  }
  0x13   :  { %988 = vmatprep.subr.bf16.mxu1 %v1179_v0  ;;  %992 = vmatprep.mubr.msk.bf16.mxu1 %vm1180_vm0, %v1179_v0  ;;  %43 = vst.msk [vmem:[#allocation2] sm:$0xff] %vm42_vm1, %v1179_v0  ;;  %44 = vst.msk [vmem:[#allocation3] sm:$0xff] %vm42_vm1, %v1179_v0  ;;  %v57_v1 = vld [vmem:[%s1406_s1] sm:$0xf]  ;;  %v45_v4 = vld [vmem:[#allocation5] sm:$0xff]  ;;  %vm65_vm3 = vcmask 64512  }
  0x14   :  { %1069 = vmatprep.subr.msk.bf16.mxu0 %vm78_vm2, %v57_v1  ;;  %v80_v2 = vsel %vm78_vm2, %v57_v1, 0  ;;  %v1246_v3 = vld [vmem:[%s1408_s3] sm:$0xff]   ;;  %v46_v5 = vld [vmem:[#allocation5 + $0x8] sm:$0xff]  ;;  %v48_v8 = vld [vmem:[#allocation5 + $0x18] sm:$0xff]  ;;  %s1181_s16 = smov 64   ;;  %s1183_s19 = smov 96  }
  0x15   :  { %979 = vmatpush3.bf16.msra.mxu0 %v80_v2  ;;  %v53_v6 = vpack.c.bf16 %v46_v5, %v45_v4  ;;  %v47_v7 = vld [vmem:[#allocation5 + $0x10] sm:$0xff]  ;;  %989 = vmatpush3.bf16.msra.mxu1 %v1246_v3  ;;  %v1252_v10 = vld [vmem:[%s1408_s3 + $0x8] sm:$0xff]   ;;  %v49_v57 = vld [vmem:[#allocation5 + $0x20] sm:$0xff]  ;;  %s1185_s27 = smov 48   ;;  %vm895_vm4 = vcmask 130048   ;;  %vm911_vm5 = vcmask 7168  }
  0x16   :  { %v54_v9 = vpack.c.bf16 %v48_v8, %v47_v7  ;;  %1004 = vmatprep.subr.bf16.mxu0 %v1179_v0  ;;  %990 = vmatprep.subr.bf16.mxu1 %v1179_v0  ;;  %v1274_v13 = vld [vmem:[%s1407_s2] ss:$0 sm:$0xff]  ;;  %s1182_s2 = smov 32   ;;  %v50_v58 = vld [vmem:[#allocation5 + $0x28] sm:$0xff]  ;;  %v52_v61 = vld [vmem:[#allocation5 + $0x38] sm:$0xff] }
  0x17   :  { %980 = vmatprep.mubr.msk.bf16.mxu0 %vm65_vm3, %v53_v6  ;;  %v51_v59 = vld [vmem:[#allocation5 + $0x30] sm:$0xff]  ;;  %v55_v60 = vpack.c.bf16 %v50_v58, %v49_v57 }
  0x18   :  { %981 = vmatmul.mubr.msk.bf16.vlgmr.msra.gmra.mrb[0].mxu0 %vm65_vm3, %v54_v9  ;;  %v56_v62 = vpack.c.bf16 %v52_v61, %v51_v59 }
  0x19   :  { %1005 = vmatpush3.bf16.msra.mxu0 %v1246_v3  ;;  %991 = vmatpush3.bf16.msra.mxu1 %v1252_v10 }
  0x1a   :  { %v159_v11 = vld [vmem:[#allocation2] sm:$0xff]  ;;  %1006 = vmatprep.subr.bf16.mxu0 %v1179_v0  ;;  %996 = vmatprep.subr.bf16.mxu1 %v1179_v0  ;;  %v160_v25 = vld [vmem:[#allocation3] sm:$0xff] }
  0x1b   :  { %v162_v12 = vpack.c.bf16 %v159_v11, %v159_v11  ;;  %984 = vmatprep.mubr.msk.bf16.mxu0 %vm65_vm3, %v55_v60 }
  0x1d   :  { %993 = vmatmul.mubr.msk.bf16.vlgmr.msra.gmra.mrb[0].mxu1 %vm42_vm1, %v162_v12  ;;  %1007 = vmatpush3.bf16.msra.mxu0 %v1252_v10 }
  0x1e   :  { %997 = vmatpush3.bf16.msra.mxu1 %v1246_v3  ;;  %1000 = vmatprep.mubr.msk.bf16.mxu1 %vm1180_vm0, %v1179_v0 }
  0x1f   :  { %998 = vmatprep.subr.bf16.mxu1 %v1179_v0  ;;  %1020 = vmatprep.subr.bf16.mxu0 %v1179_v0 }
  0x20   :  { %985 = vmatmul.mubr.msk.bf16.gmra.mrb[4].mxu0 %vm65_vm3, %v56_v62 }
  0x21   :  { %1008 = vmatprep.mubr.msk.bf16.mxu0 %vm1180_vm0, %v1179_v0 }
  0x22   :  { %999 = vmatpush3.bf16.msra.mxu1 %v1252_v10 }
  0x23   :  { %1012 = vmatprep.subr.bf16.mxu1 %v1179_v0 }
  0xeb   :  { %v1276_v14 = vpop.f32.mrb[0].mxu0 }
  0xec   :  { %v116_v15 = vpop.f32.mrb[1].mxu0  ;;  %v125_v11 = vadd.f32 %v1276_v14, %v1274_v13 }
  0xed   :  { %v117_v16 = vadd.f32 %v1274_v13, %v116_v15  ;;  %v1279_v17 = vpop.f32.mrb[2].mxu0 }
  0xee   :  { %v119_v18 = vpop.f32.mrb[3].mxu0 }
  0xef   :  { %v120_v41 = vadd.f32 %v1274_v13, %v119_v18 }
  0xf0   :  { %v213_v19 = vpop.f32.mrb[0].mxu1 }
  0xf1   :  { %v219_v20 = vadd.f32 %v213_v19, %v117_v16  ;;  %v994_v21 = vpop.f32.mrb[1].mxu1 }
  0xf2   :  { %v216_v22 = vpop.f32.mrb[2].mxu1 }
  0xf3   :  { %1082 = vtanh.f32 %v219_v20  ;;  %v995_v23 = vpop.f32.mrb[3].mxu1  ;;  %v926_v26 = vmul.f32 -1.442695, %v219_v20  ;;  %v1302_v5 = vpop.f32.mrb[4].mxu0 }
  0xf4   :  { %v1304_v6 = vpop.f32.mrb[5].mxu0 }
  0xf5   :  { %1084 = vpow2.f32 %v926_v26  ;;  %v1306_v7 = vpop.f32.mrb[6].mxu0 }
  0xf6   :  { %v1308_v8 = vpop.f32.mrb[7].mxu0 }
  0xfd   :  { %v1083_v24 = vpop.eup %1082 }
  0xfe   :  { %233 = vrot.lane.b32.xlu0 %v1083_v24, %s1181_s16 }
  0xff   :  { %v1085_v27 = vpop.eup %1084 }
 0x100   :  { %v223_v28 = vadd.f32 1.0, %v1085_v27 }
 0x102   :  { %228 = vrot.lane.b32.xlu0 %v160_v25, %s1182_s2  ;;  %1086 = vrcp.f32 %v223_v28 }
 0x10c   :  { %v1087_v29 = vpop.eup %1086 }
 0x170   :  { %v234_v30 = vpop.permute.xlu0 %233 }
 0x171   :  { %v236_v31 = vmul.f32 %v1087_v29, %v234_v30 }
 0x173   :  { %238 = vrot.lane.b32.xlu1 %v236_v31, %s1182_s2 }
 0x174   :  { %v229_v32 = vpop.permute.xlu0 %228 }
 0x175   :  { %v231_v33 = vmul.f32 %v1087_v29, %v229_v32 }
 0x1e5   :  { %v239_v34 = vpop.permute.xlu1 %238 }
 0x1e6   :  { %v241_v35 = vadd.f32 %v239_v34, %v231_v33  ;;  %v128_v34 = vadd.f32 %v1279_v17, %v1274_v13 }
 0x1e8   :  { %1088 = vtanh.f32 %v241_v35 }
 0x1f2   :  { %v1089_v36 = vpop.eup %1088 }
 0x1f3   :  { %244 = vrot.lane.b32.xlu1 %v1089_v36, %s1181_s16 }
 0x265   :  { %v245_v37 = vpop.permute.xlu1 %244 }
 0x266   :  { %v247_v38 = vmul.f32 %v1087_v29, %v245_v37 }
 0x268   :  { %v250_v39 = vpack.c.bf16 %v247_v38, %v247_v38 }
 0x26a   :  { %252 = vrot.lane.b32.xlu0 %v250_v39, %s1182_s2 }
 0x2dc   :  { %v253_v40 = vpop.permute.xlu0 %252 }
 0x2dd   :  { %1001 = vmatmul.mubr.msk.bf16.vlgmr.msra.gmra.mrb[4].mxu1 %vm42_vm1, %v253_v40 }
 0x2de   :  { %1013 = vmatpush3.bf16.msra.mxu1 %v1246_v3  ;;  %1016 = vmatprep.mubr.msk.bf16.mxu1 %vm1180_vm0, %v1179_v0 }
 0x2df   :  { %1014 = vmatprep.subr.bf16.mxu1 %v1179_v0 }
 0x2e2   :  { %1015 = vmatpush3.bf16.msra.mxu1 %v1252_v10 }
 0x2e3   :  { %1028 = vmatprep.subr.bf16.mxu1 %v1179_v0 }
 0x3b0   :  { %v291_v42 = vpop.f32.mrb[4].mxu1 }
 0x3b1   :  { %v297_v43 = vadd.f32 %v291_v42, %v120_v41  ;;  %v1002_v44 = vpop.f32.mrb[5].mxu1 }
 0x3b2   :  { %v294_v45 = vpop.f32.mrb[6].mxu1 }
 0x3b3   :  { %1090 = vtanh.f32 %v297_v43  ;;  %v1003_v46 = vpop.f32.mrb[7].mxu1  ;;  %v928_v48 = vmul.f32 -1.442695, %v297_v43 }
 0x3b5   :  { %1092 = vpow2.f32 %v928_v48 }
 0x3bd   :  { %v1091_v47 = vpop.eup %1090 }
 0x3be   :  { %307 = vrot.lane.b32.xlu1 %v1091_v47, %s1181_s16 }
 0x3bf   :  { %v1093_v49 = vpop.eup %1092 }
 0x3c0   :  { %v301_v50 = vadd.f32 1.0, %v1093_v49 }
 0x3c2   :  { %1094 = vrcp.f32 %v301_v50 }
 0x3cc   :  { %v1095_v51 = vpop.eup %1094 }
 0x3cd   :  { %v305_v54 = vmul.f32 %v1095_v51, %v241_v35 }
 0x430   :  { %v308_v52 = vpop.permute.xlu1 %307 }
 0x431   :  { %v310_v53 = vmul.f32 %v1095_v51, %v308_v52 }
 0x433   :  { %312 = vrot.lane.b32.xlu0 %v310_v53, %s1182_s2 }
 0x4a5   :  { %v313_v55 = vpop.permute.xlu0 %312 }
 0x4a6   :  { %v315_v56 = vadd.f32 %v313_v55, %v305_v54  ;;  %v133_v54 = vadd.f32 %v1274_v13, %v1304_v6 }
 0x4a8   :  { %1096 = vtanh.f32 %v315_v56 }
 0x4b2   :  { %v1097_v63 = vpop.eup %1096 }
 0x4b3   :  { %318 = vrot.lane.b32.xlu1 %v1097_v63, %s1181_s16 }
 0x525   :  { %v319_v1 = vpop.permute.xlu1 %318 }
 0x526   :  { %v321_v2 = vmul.f32 %v1095_v51, %v319_v1 }
 0x528   :  { %v324_v4 = vpack.c.bf16 %v321_v2, %v321_v2 }
 0x52a   :  { %326 = vrot.lane.b32.xlu0 %v324_v4, %s1182_s2 }
 0x59c   :  { %v327_v9 = vpop.permute.xlu0 %326 }
 0x59d   :  { %1009 = vmatmul.mubr.msk.bf16.vlgmr.msra.gmra.mrb[8].mxu0 %vm42_vm1, %v327_v9 }
 0x59e   :  { %1021 = vmatpush3.bf16.msra.mxu0 %v1246_v3  ;;  %1024 = vmatprep.mubr.msk.bf16.mxu0 %vm1180_vm0, %v1179_v0 }
 0x59f   :  { %1022 = vmatprep.subr.bf16.mxu0 %v1179_v0 }
 0x5a2   :  { %1023 = vmatpush3.bf16.msra.mxu0 %v1252_v10 }
 0x5a3   :  { %1036 = vmatprep.subr.bf16.mxu0 %v1179_v0 }
 0x670   :  { %v365_v12 = vpop.f32.mrb[8].mxu0 }
 0x671   :  { %v371_v15 = vadd.f32 %v365_v12, %v125_v11  ;;  %v1010_v16 = vpop.f32.mrb[9].mxu0 }
 0x672   :  { %v368_v18 = vpop.f32.mrb[10].mxu0 }
 0x673   :  { %1098 = vtanh.f32 %v371_v15  ;;  %v1011_v19 = vpop.f32.mrb[11].mxu0  ;;  %v930_v21 = vmul.f32 -1.442695, %v371_v15 }
 0x675   :  { %1100 = vpow2.f32 %v930_v21 }
 0x67d   :  { %v1099_v20 = vpop.eup %1098 }
 0x67e   :  { %381 = vrot.lane.b32.xlu1 %v1099_v20, %s1181_s16  ;;  %v136_v20 = vadd.f32 %v1274_v13, %v1308_v8 }
 0x67f   :  { %v1101_v22 = vpop.eup %1100 }
 0x680   :  { %v375_v23 = vadd.f32 1.0, %v1101_v22 }
 0x682   :  { %1102 = vrcp.f32 %v375_v23 }
 0x68c   :  { %v1103_v24 = vpop.eup %1102 }
 0x68d   :  { %v379_v14 = vmul.f32 %v1103_v24, %v315_v56 }
 0x6f0   :  { %v382_v25 = vpop.permute.xlu1 %381 }
 0x6f1   :  { %v384_v26 = vmul.f32 %v1103_v24, %v382_v25 }
 0x6f3   :  { %386 = vrot.lane.b32.xlu0 %v384_v26, %s1182_s2 }
 0x765   :  { %v387_v27 = vpop.permute.xlu0 %386 }
 0x766   :  { %v389_v28 = vadd.f32 %v387_v27, %v379_v14 }
 0x768   :  { %1104 = vtanh.f32 %v389_v28 }
 0x772   :  { %v1105_v29 = vpop.eup %1104 }
 0x773   :  { %392 = vrot.lane.b32.xlu1 %v1105_v29, %s1181_s16 }
 0x7e5   :  { %v393_v30 = vpop.permute.xlu1 %392 }
 0x7e6   :  { %v395_v31 = vmul.f32 %v1103_v24, %v393_v30 }
 0x7e8   :  { %v398_v32 = vpack.c.bf16 %v395_v31, %v395_v31 }
 0x7ea   :  { %400 = vrot.lane.b32.xlu0 %v398_v32, %s1182_s2 }
 0x85c   :  { %v401_v33 = vpop.permute.xlu0 %400 }
 0x85d   :  { %1017 = vmatmul.mubr.msk.bf16.vlgmr.msra.gmra.mrb[8].mxu1 %vm42_vm1, %v401_v33 }
 0x85e   :  { %1029 = vmatpush3.bf16.msra.mxu1 %v1246_v3  ;;  %1032 = vmatprep.mubr.msk.bf16.mxu1 %vm1180_vm0, %v1179_v0 }
 0x85f   :  { %1030 = vmatprep.subr.bf16.mxu1 %v1179_v0 }
 0x862   :  { %1031 = vmatpush3.bf16.msra.mxu1 %v1252_v10 }
 0x863   :  { %1044 = vmatprep.subr.bf16.mxu1 %v1179_v0 }
 0x930   :  { %v439_v35 = vpop.f32.mrb[8].mxu1 }
 0x931   :  { %v445_v36 = vadd.f32 %v439_v35, %v128_v34  ;;  %v1018_v37 = vpop.f32.mrb[9].mxu1 }
 0x932   :  { %v442_v38 = vpop.f32.mrb[10].mxu1  ;;  %v141_v37 = vadd.f32 %v1302_v5, %v1274_v13 }
 0x933   :  { %1106 = vtanh.f32 %v445_v36  ;;  %v1019_v39 = vpop.f32.mrb[11].mxu1  ;;  %v932_v41 = vmul.f32 -1.442695, %v445_v36 }
 0x935   :  { %1108 = vpow2.f32 %v932_v41 }
 0x93d   :  { %v1107_v40 = vpop.eup %1106 }
 0x93e   :  { %455 = vrot.lane.b32.xlu1 %v1107_v40, %s1181_s16 }
 0x93f   :  { %v1109_v42 = vpop.eup %1108 }
 0x940   :  { %v449_v43 = vadd.f32 1.0, %v1109_v42 }
 0x942   :  { %1110 = vrcp.f32 %v449_v43 }
 0x94c   :  { %v1111_v44 = vpop.eup %1110 }
 0x94d   :  { %v453_v17 = vmul.f32 %v1111_v44, %v389_v28 }
 0x9b0   :  { %v456_v45 = vpop.permute.xlu1 %455 }
 0x9b1   :  { %v458_v46 = vmul.f32 %v1111_v44, %v456_v45 }
 0x9b3   :  { %460 = vrot.lane.b32.xlu0 %v458_v46, %s1182_s2 }
 0xa25   :  { %v461_v47 = vpop.permute.xlu0 %460 }
 0xa26   :  { %v463_v48 = vadd.f32 %v461_v47, %v453_v17 }
 0xa28   :  { %1112 = vtanh.f32 %v463_v48 }
 0xa32   :  { %v1113_v49 = vpop.eup %1112 }
 0xa33   :  { %466 = vrot.lane.b32.xlu1 %v1113_v49, %s1181_s16 }
 0xaa5   :  { %v467_v50 = vpop.permute.xlu1 %466 }
 0xaa6   :  { %v469_v51 = vmul.f32 %v1111_v44, %v467_v50 }
 0xaa8   :  { %v472_v52 = vpack.c.bf16 %v469_v51, %v469_v51 }
 0xaaa   :  { %474 = vrot.lane.b32.xlu0 %v472_v52, %s1182_s2 }
 0xb1c   :  { %v475_v53 = vpop.permute.xlu0 %474 }
 0xb1d   :  { %1025 = vmatmul.mubr.msk.bf16.vlgmr.msra.gmra.mrb[12].mxu0 %vm42_vm1, %v475_v53 }
 0xb1e   :  { %1037 = vmatpush3.bf16.msra.mxu0 %v1246_v3  ;;  %1040 = vmatprep.mubr.msk.bf16.mxu0 %vm1180_vm0, %v1179_v0 }
 0xb1f   :  { %1038 = vmatprep.subr.bf16.mxu0 %v1179_v0 }
 0xb22   :  { %1039 = vmatpush3.bf16.msra.mxu0 %v1252_v10 }
 0xbf0   :  { %v513_v55 = vpop.f32.mrb[12].mxu0 }
 0xbf1   :  { %v519_v56 = vadd.f32 %v513_v55, %v133_v54  ;;  %v1026_v57 = vpop.f32.mrb[13].mxu0  ;;  %v144_v55 = vadd.f32 %v1306_v7, %v1274_v13 }
 0xbf2   :  { %v516_v58 = vpop.f32.mrb[14].mxu0 }
 0xbf3   :  { %1114 = vtanh.f32 %v519_v56  ;;  %v1027_v59 = vpop.f32.mrb[15].mxu0  ;;  %v934_v61 = vmul.f32 -1.442695, %v519_v56 }
 0xbf5   :  { %1116 = vpow2.f32 %v934_v61 }
 0xbfd   :  { %v1115_v60 = vpop.eup %1114 }
 0xbfe   :  { %529 = vrot.lane.b32.xlu1 %v1115_v60, %s1181_s16 }
 0xbff   :  { %v1117_v62 = vpop.eup %1116 }
 0xc00   :  { %v523_v63 = vadd.f32 1.0, %v1117_v62 }
 0xc02   :  { %1118 = vrcp.f32 %v523_v63 }
 0xc0c   :  { %v1119_v1 = vpop.eup %1118 }
 0xc0d   :  { %v527_v6 = vmul.f32 %v1119_v1, %v463_v48 }
 0xc70   :  { %v530_v2 = vpop.permute.xlu1 %529 }
 0xc71   :  { %v532_v4 = vmul.f32 %v1119_v1, %v530_v2 }
 0xc73   :  { %534 = vrot.lane.b32.xlu0 %v532_v4, %s1182_s2 }
 0xce5   :  { %v535_v9 = vpop.permute.xlu0 %534 }
 0xce6   :  { %v537_v11 = vadd.f32 %v535_v9, %v527_v6 }
 0xce8   :  { %1120 = vtanh.f32 %v537_v11 }
 0xcf2   :  { %v1121_v12 = vpop.eup %1120 }
 0xcf3   :  { %540 = vrot.lane.b32.xlu1 %v1121_v12, %s1181_s16 }
 0xd65   :  { %v541_v15 = vpop.permute.xlu1 %540 }
 0xd66   :  { %v543_v16 = vmul.f32 %v1119_v1, %v541_v15 }
 0xd68   :  { %v546_v18 = vpack.c.bf16 %v543_v16, %v543_v16 }
 0xd6a   :  { %548 = vrot.lane.b32.xlu0 %v546_v18, %s1182_s2 }
 0xddc   :  { %v549_v19 = vpop.permute.xlu0 %548 }
 0xddd   :  { %1033 = vmatmul.mubr.msk.bf16.vlgmr.msra.gmra.mrb[12].mxu1 %vm42_vm1, %v549_v19  ;;  %v941_v19 = vld [vmem:[%s1410_s5] ss:$0 sm:$0xff] }
 0xdde   :  { %1045 = vmatpush3.bf16.msra.mxu1 %v1246_v3  ;;  %1048 = vmatprep.mubr.msk.bf16.mxu1 %vm1180_vm0, %v1179_v0 }
 0xddf   :  { %1046 = vmatprep.subr.bf16.mxu1 %v1179_v0 }
 0xde2   :  { %1047 = vmatpush3.bf16.msra.mxu1 %v1252_v10 }
 0xeb0   :  { %v587_v21 = vpop.f32.mrb[12].mxu1 }
 0xeb1   :  { %v593_v22 = vadd.f32 %v587_v21, %v136_v20  ;;  %v1034_v23 = vpop.f32.mrb[13].mxu1 }
 0xeb2   :  { %v590_v24 = vpop.f32.mrb[14].mxu1 }
 0xeb3   :  { %1122 = vtanh.f32 %v593_v22  ;;  %v1035_v25 = vpop.f32.mrb[15].mxu1  ;;  %v936_v3 = vmul.f32 -1.442695, %v593_v22 }
 0xeb5   :  { %1124 = vpow2.f32 %v936_v3  ;;  %v812_v3 = vld [vmem:[%s1409_s4 + $0x8] sm:$0xff] }
 0xebd   :  { %v1123_v26 = vpop.eup %1122 }
 0xebe   :  { %603 = vrot.lane.b32.xlu1 %v1123_v26, %s1181_s16  ;;  %v811_v26 = vld [vmem:[%s1409_s4] sm:$0xff] }
 0xebf   :  { %v1125_v14 = vpop.eup %1124 }
 0xec0   :  { %v597_v27 = vadd.f32 1.0, %v1125_v14  ;;  %v813_v14 = vld [vmem:[%s1409_s4 + $0x10] sm:$0xff] }
 0xec2   :  { %1126 = vrcp.f32 %v597_v27  ;;  %v1184_v27 = vmov 0.0|0.0  }
 0xec3   :  { %1063 = vmatprep.subr.bf16.mxu0 %v1184_v27 }
 0xecc   :  { %v1127_v28 = vpop.eup %1126 }
 0xecd   :  { %v601_v8 = vmul.f32 %v1127_v28, %v537_v11 }
 0xf30   :  { %v604_v29 = vpop.permute.xlu1 %603 }
 0xf31   :  { %v606_v10 = vmul.f32 %v1127_v28, %v604_v29  ;;  %v814_v29 = vld [vmem:[%s1409_s4 + $0x18] sm:$0xff] }
 0xf33   :  { %608 = vrot.lane.b32.xlu0 %v606_v10, %s1182_s2  ;;  %v1067_v10 = vpack.c.bf16 %v814_v29, %v813_v14 }
 0xfa5   :  { %v609_v30 = vpop.permute.xlu0 %608 }
 0xfa6   :  { %v611_v31 = vadd.f32 %v609_v30, %v601_v8 }
 0xfa8   :  { %1128 = vtanh.f32 %v611_v31 }
 0xfb2   :  { %v1129_v32 = vpop.eup %1128 }
 0xfb3   :  { %614 = vrot.lane.b32.xlu1 %v1129_v32, %s1181_s16 }
0x1025   :  { %v615_v33 = vpop.permute.xlu1 %614 }
0x1026   :  { %v617_v34 = vmul.f32 %v1127_v28, %v615_v33  ;;  %v1064_v28 = vpack.c.bf16 %v812_v3, %v811_v26 }
0x1028   :  { %v620_v35 = vpack.c.bf16 %v617_v34, %v617_v34 }
0x102a   :  { %622 = vrot.lane.b32.xlu0 %v620_v35, %s1182_s2 }
0x109c   :  { %v623_v36 = vpop.permute.xlu0 %622 }
0x109d   :  { %1041 = vmatmul.mubr.msk.bf16.vlgmr.msra.gmra.mrb[16].mxu0 %vm42_vm1, %v623_v36 }
0x109e   :  { %1060 = vmatprep.mubr.msk.f32.mxu0 %vm1180_vm0, %v1179_v0  ;;  %1065 = vmatpush3.bf16.msra.mxu0 %v1064_v28 }
0x109f   :  { %1066 = vmatprep.subr.bf16.mxu0 %v1184_v27 }
0x10a2   :  { %1068 = vmatpush3.bf16.msra.mxu0 %v1067_v10 }
0x1170   :  { %v661_v38 = vpop.f32.mrb[16].mxu0 }
0x1171   :  { %v667_v39 = vadd.f32 %v661_v38, %v141_v37  ;;  %v1042_v40 = vpop.f32.mrb[17].mxu0 }
0x1172   :  { %v664_v41 = vpop.f32.mrb[18].mxu0 }
0x1173   :  { %1130 = vtanh.f32 %v667_v39  ;;  %v1043_v42 = vpop.f32.mrb[19].mxu0  ;;  %v938_v44 = vmul.f32 -1.442695, %v667_v39 }
0x1175   :  { %1132 = vpow2.f32 %v938_v44 }
0x117d   :  { %v1131_v43 = vpop.eup %1130 }
0x117e   :  { %677 = vrot.lane.b32.xlu1 %v1131_v43, %s1181_s16 }
0x117f   :  { %v1133_v45 = vpop.eup %1132 }
0x1180   :  { %v671_v46 = vadd.f32 1.0, %v1133_v45 }
0x1182   :  { %1134 = vrcp.f32 %v671_v46 }
0x118c   :  { %v1135_v17 = vpop.eup %1134 }
0x118d   :  { %v675_v5 = vmul.f32 %v1135_v17, %v611_v31 }
0x11f0   :  { %v678_v47 = vpop.permute.xlu1 %677 }
0x11f1   :  { %v680_v0 = vmul.f32 %v1135_v17, %v678_v47 }
0x11f3   :  { %682 = vrot.lane.b32.xlu0 %v680_v0, %s1182_s2 }
0x1265   :  { %v683_v48 = vpop.permute.xlu0 %682 }
0x1266   :  { %v685_v49 = vadd.f32 %v683_v48, %v675_v5 }
0x1268   :  { %1136 = vtanh.f32 %v685_v49 }
0x1272   :  { %v1137_v50 = vpop.eup %1136 }
0x1273   :  { %688 = vrot.lane.b32.xlu1 %v1137_v50, %s1181_s16 }
0x12e5   :  { %v689_v51 = vpop.permute.xlu1 %688 }
0x12e6   :  { %v691_v52 = vmul.f32 %v1135_v17, %v689_v51 }
0x12e8   :  { %v694_v53 = vpack.c.bf16 %v691_v52, %v691_v52 }
0x12ea   :  { %696 = vrot.lane.b32.xlu0 %v694_v53, %s1182_s2 }
0x135c   :  { %v697_v54 = vpop.permute.xlu0 %696 }
0x135d   :  { %1049 = vmatmul.mubr.msk.bf16.vlgmr.msra.gmra.mrb[16].mxu1 %vm42_vm1, %v697_v54 }
0x1430   :  { %v735_v56 = vpop.f32.mrb[16].mxu1 }
0x1431   :  { %v741_v57 = vadd.f32 %v735_v56, %v144_v55  ;;  %v1050_v58 = vpop.f32.mrb[17].mxu1 }
0x1432   :  { %v738_v59 = vpop.f32.mrb[18].mxu1 }
0x1433   :  { %1138 = vtanh.f32 %v741_v57  ;;  %v1051_v60 = vpop.f32.mrb[19].mxu1  ;;  %v940_v62 = vmul.f32 -1.442695, %v741_v57 }
0x1435   :  { %1140 = vpow2.f32 %v940_v62 }
0x143d   :  { %v1139_v61 = vpop.eup %1138 }
0x143e   :  { %751 = vrot.lane.b32.xlu1 %v1139_v61, %s1181_s16 }
0x143f   :  { %v1141_v63 = vpop.eup %1140 }
0x1440   :  { %v745_v1 = vadd.f32 1.0, %v1141_v63 }
0x1442   :  { %1142 = vrcp.f32 %v745_v1 }
0x144c   :  { %v1143_v2 = vpop.eup %1142 }
0x144d   :  { %v749_v13 = vmul.f32 %v1143_v2, %v685_v49 }
0x14b0   :  { %v752_v4 = vpop.permute.xlu1 %751 }
0x14b1   :  { %v754_v6 = vmul.f32 %v1143_v2, %v752_v4 }
0x14b3   :  { %756 = vrot.lane.b32.xlu0 %v754_v6, %s1182_s2 }
0x1525   :  { %v757_v7 = vpop.permute.xlu0 %756 }
0x1526   :  { %v759_v9 = vadd.f32 %v757_v7, %v749_v13 }
0x1528   :  { %1144 = vtanh.f32 %v759_v9 }
0x1532   :  { %v1145_v11 = vpop.eup %1144 }
0x1533   :  { %762 = vrot.lane.b32.xlu1 %v1145_v11, %s1181_s16 }
0x15a5   :  { %v763_v12 = vpop.permute.xlu1 %762 }
0x15a6   :  { %v765_v15 = vmul.f32 %v1143_v2, %v763_v12 }
0x15a8   :  { %767 = vrot.lane.b32.xlu0 %v765_v15, %s1182_s2 }
0x161a   :  { %v768_v16 = vpop.permute.xlu0 %767 }
0x161b   :  { %770 = vst.msk [vmem:[#allocation2] sm:$0xff] %vm42_vm1, %v768_v16  ;;  %v780_v18 = vsel %vm42_vm1, %v768_v16, 0.0 }
0x161c   :  { %781 = vadd.xlane.f32.xlu1 %v780_v18 }
0x162d   :  { %803 = vrot.lane.b32.xlu1 %v941_v19, %s1183_s19 }
0x16a9   :  { %v782_v20 = vpop.xlane.xlu1 %781 }
0x16aa   :  { %v784_v21 = vmul.f32 0.03125, %v782_v20 }
0x16ac   :  { %v785_v22 = vsub.f32 %v765_v15, %v784_v21 }
0x16ad   :  { %v804_v33 = vpop.permute.xlu1 %803 }
0x16ae   :  { %v786_v23 = vmul.f32 %v785_v22, %v785_v22 }
0x16b0   :  { %788 = vrot.lane.b32.xlu0 %v786_v23, %s1182_s2 }
0x1722   :  { %v789_v24 = vpop.permute.xlu0 %788 }
0x1723   :  { %v791_v25 = vsel %vm42_vm1, %v789_v24, 0.0 }
0x1724   :  { %792 = vadd.xlane.f32.xlu0 %v791_v25 }
0x173a   :  { %807 = vrot.lane.b32.xlu0 %v941_v19, %s1181_s16 }
0x17b1   :  { %v793_v8 = vpop.xlane.xlu0 %792 }
0x17b2   :  { %v794_v30 = vmul.f32 0.03125, %v793_v8 }
0x17b4   :  { %v795_v31 = vadd.f32 1e-05, %v794_v30 }
0x17b5   :  { %v808_v35 = vpop.permute.xlu0 %807 }
0x17b6   :  { %1146 = vrsqrt.f32 %v795_v31 }
0x17c0   :  { %v1147_v32 = vpop.eup %1146 }
0x17c1   :  { %v797_v34 = vmul.f32 %v1147_v32, %v785_v22 }
0x17c3   :  { %v806_v36 = vmul.f32 %v804_v33, %v797_v34 }
0x17c5   :  { %v810_v37 = vadd.f32 %v808_v35, %v806_v36 }
0x17c7   :  { %816 = vrot.lane.b32.xlu1 %v810_v37, %s1182_s2 }
0x17cb   :  { %891 = vrot.lane.b32.xlu1 %v941_v19, %s1185_s27 }
0x17cf   :  { %772 = vrot.lane.b32.xlu1 %v759_v9, %s1183_s19 }
0x1839   :  { %v817_v38 = vpop.permute.xlu1 %816 }
0x183a   :  { %1061 = vmatmul.mubr.msk.f32.vlgmr.msra.gmra.mrb[20].mxu0 %vm42_vm1, %v817_v38 }
0x183d   :  { %v892_v39 = vpop.permute.xlu1 %891 }
0x1841   :  { %v773_v40 = vpop.permute.xlu1 %772 }
0x1842   :  { %775 = vst.msk [vmem:[#allocation3] sm:$0xff] %vm42_vm1, %v773_v40 }
0x190d   :  { %v886_v41 = vpop.f32.mrb[20].mxu0 }
0x190e   :  { %v887_v42 = vadd.f32 %v886_v41, %v808_v35  ;;  %v1062_v43 = vpop.f32.mrb[21].mxu0 }
0x1910   :  { %v890_v44 = vmax.f32 %v887_v42, 0.0 }
0x1912   :  { %v894_v45 = vmul.f32 %v892_v39, %v890_v44 }
0x1914   :  { %v896_v46 = vsel %vm895_vm4, %v894_v45, 0.0 }
0x1915   :  { %897 = vadd.xlane.f32.xlu0 %v896_v46 }
0x19a2   :  { %v898_v17 = vpop.xlane.xlu0 %897 }
0x19a3   :  { %v900_v47 = vadd.f32 %v941_v19, %v898_v17 }
0x19a5   :  { %v943_v0 = vmul.f32 -1.442695, %v900_v47 }
0x19a7   :  { %1148 = vpow2.f32 %v943_v0 }
0x19b1   :  { %v1149_v5 = vpop.eup %1148 }
0x19b2   :  { %v904_v48 = vadd.f32 1.0, %v1149_v5 }
0x19b4   :  { %1150 = vrcp.f32 %v904_v48 }
0x19be   :  { %v1151_v49 = vpop.eup %1150 }
0x19bf   :  { %908 = vrot.lane.b32.xlu1 %v1151_v49, %s1182_s2 }
0x1a31   :  { %v909_v50 = vpop.permute.xlu1 %908 }
0x1a32   :  { %912 = vst.msk [vmem:[%s1411_s6] sm:$0xff] %vm911_vm5, %v909_v50 }
0x1a33   :  { %917 = vsyncpa [#allocation6], 1 }

</bundles_post_ra>
